<compile_context>
chip_gen: v6e
topology: v6e:2x2x1
jax: 0.10.0
libtpu: 0.0.40
codegen_flags: <defaults>
</compile_context>

<pallas_src>
import jax
import jax.numpy as jnp
from jax.experimental import pallas as pl
from jax.experimental.pallas import tpu as pltpu


def _round_up(a, m):
    return (a + m - 1) // m * m


def _mlp_kernel(w1_ref, b1_ref, w2_ref, b2_ref, w3_ref, b3_ref, x_ref, o_ref):
    # x_ref: [3, TB] VMEM tile (features x batch-lanes)
    # w*/b*_ref: flat 1-D SMEM scalars
    x = x_ref[...]
    x_rows = [x[0:1, :], x[1:2, :], x[2:3, :]]  # each [1, TB]

    # Layer 1: 3 -> 3, sigmoid.  w1 flat row-major [in=3, out=3].
    h1 = []
    for j in range(3):
        acc = b1_ref[j] + (w1_ref[0 * 3 + j] * x_rows[0]
                           + w1_ref[1 * 3 + j] * x_rows[1]
                           + w1_ref[2 * 3 + j] * x_rows[2])
        h1.append(jax.nn.sigmoid(acc))

    # Layer 2: 3 -> 2, sigmoid.  w2 flat row-major [in=3, out=2].
    h2 = []
    for j in range(2):
        acc = b2_ref[j] + (w2_ref[0 * 2 + j] * h1[0]
                           + w2_ref[1 * 2 + j] * h1[1]
                           + w2_ref[2 * 2 + j] * h1[2])
        h2.append(jax.nn.sigmoid(acc))

    # Layer 3: 2 -> 1, no activation (matches the PyTorch module).
    out = w3_ref[0] * h2[0] + w3_ref[1] * h2[1] + b3_ref[0]   # [1, TB]
    o_ref[...] = out.astype(o_ref.dtype)


def mymodel_forward(x, w1, b1, w2, b2, w3, b3):
    """x: [B, 3] float32. Weights stored as [in, out], biases as [out]."""
    B, F = x.shape
    assert F == 3

    # Batch tile: multiple of 128 (lane width); cap at 512 rows per tile.
    TB = 512 if B >= 512 else _round_up(B, 128)
    B_pad = _round_up(B, TB)

    # Lane-major layout: features on sublanes, batch on lanes; zero-pad batch.
    x_t = jnp.zeros((F, B_pad), x.dtype).at[:, :B].set(x.T)

    smem_spec = pl.BlockSpec(memory_space=pltpu.MemorySpace.SMEM)

    out = pl.pallas_call(
        _mlp_kernel,
        out_shape=jax.ShapeDtypeStruct((1, B_pad), jnp.float32),
        grid=(B_pad // TB,),
        in_specs=[
            smem_spec,  # w1 (flat, 9)
            smem_spec,  # b1 (3)
            smem_spec,  # w2 (flat, 6)
            smem_spec,  # b2 (2)
            smem_spec,  # w3 (flat, 2)
            smem_spec,  # b3 (1)
            pl.BlockSpec((F, TB), lambda i: (0, i)),
        ],
        out_specs=pl.BlockSpec((1, TB), lambda i: (0, i)),
        compiler_params=pltpu.CompilerParams(
            dimension_semantics=("parallel",)),
    )(w1.reshape(-1), b1.reshape(-1), w2.reshape(-1),
      b2.reshape(-1), w3.reshape(-1), b3.reshape(-1), x_t)

    return out[:, :B].T  # [B, 1]


def init_params(key):
    """Deterministic init mimicking PyTorch Linear default (U[-1/sqrt(fan_in), +])."""
    def linear_init(k, fan_in, fan_out):
        kw, kb = jax.random.split(k)
        bound = 1.0 / jnp.sqrt(fan_in)
        # stored as [in, out] so forward is x @ W + b
        w = jax.random.uniform(kw, (fan_in, fan_out), jnp.float32, -bound, bound)
        b = jax.random.uniform(kb, (fan_out,), jnp.float32, -bound, bound)
        return w, b

    k1, k2, k3 = jax.random.split(key, 3)
    w1, b1 = linear_init(k1, 3, 3)
    w2, b2 = linear_init(k2, 3, 2)
    w3, b3 = linear_init(k3, 2, 1)
    return w1, b1, w2, b2, w3, b3


def reference_forward(x, w1, b1, w2, b2, w3, b3):
    h1 = jax.nn.sigmoid(x @ w1 + b1)
    h2 = jax.nn.sigmoid(h1 @ w2 + b2)
    return h2 @ w3 + b3


if __name__ == "__main__":
    key = jax.random.PRNGKey(0)
    kx, kp = jax.random.split(key)

    B = 8  # small batch; feature dim = 3 per the module
    x = jax.random.normal(kx, (B, 3), jnp.float32)
    params = init_params(kp)

    out = mymodel_forward(x, *params)
    out = jax.block_until_ready(out)

    ref = reference_forward(x, *params)
    assert out.shape == (B, 1)
    assert jnp.allclose(out, ref, atol=1e-5, rtol=1e-5)

    print("KERNEL_OK")
</pallas_src>

<mosaic_0001>
module attributes {stable_mosaic.version = 11 : i64} {
  func.func @_mlp_kernel(%arg0: i32, %arg1: memref<9xf32, #tpu.memory_space<smem>>, %arg2: memref<3xf32, #tpu.memory_space<smem>>, %arg3: memref<6xf32, #tpu.memory_space<smem>>, %arg4: memref<2xf32, #tpu.memory_space<smem>>, %arg5: memref<2xf32, #tpu.memory_space<smem>>, %arg6: memref<1xf32, #tpu.memory_space<smem>>, %arg7: memref<3x128xf32, #tpu.memory_space<vmem>>, %arg8: memref<1x128xf32, #tpu.memory_space<vmem>>) attributes {dimension_semantics = [#tpu.dimension_semantics<parallel>], iteration_bounds = array<i64: 1>, scalar_prefetch = 0 : i64, scratch_operands = 0 : i64, tpu.core_type = #tpu.core_type<tc>, window_params = [{transform_indices = @transform_0, window_bounds = array<i64: 9>}, {transform_indices = @transform_1, window_bounds = array<i64: 3>}, {transform_indices = @transform_2, window_bounds = array<i64: 6>}, {transform_indices = @transform_3, window_bounds = array<i64: 2>}, {transform_indices = @transform_4, window_bounds = array<i64: 2>}, {transform_indices = @transform_5, window_bounds = array<i64: 1>}, {transform_indices = @transform_6, window_bounds = array<i64: 3, 128>}, {transform_indices = @transform_7, window_bounds = array<i64: 1, 128>}]} {
    %c0 = arith.constant 0 : index
    %c0_0 = arith.constant 0 : index
    %0 = vector.load %arg7[%c0, %c0_0] : memref<3x128xf32, #tpu.memory_space<vmem>>, vector<3x128xf32>
    %1 = vector.extract_strided_slice %0 {offsets = [0, 0], sizes = [1, 128], strides = [1, 1]} : vector<3x128xf32> to vector<1x128xf32>
    %2 = vector.extract_strided_slice %0 {offsets = [1, 0], sizes = [1, 128], strides = [1, 1]} : vector<3x128xf32> to vector<1x128xf32>
    %3 = vector.extract_strided_slice %0 {offsets = [2, 0], sizes = [1, 128], strides = [1, 1]} : vector<3x128xf32> to vector<1x128xf32>
    %c0_1 = arith.constant 0 : index
    %4 = memref.load %arg2[%c0_1] : memref<3xf32, #tpu.memory_space<smem>>
    %c0_2 = arith.constant 0 : index
    %5 = memref.load %arg1[%c0_2] : memref<9xf32, #tpu.memory_space<smem>>
    %6 = vector.broadcast %5 : f32 to vector<1x128xf32>
    %7 = arith.mulf %6, %1 : vector<1x128xf32>
    %c3 = arith.constant 3 : index
    %8 = memref.load %arg1[%c3] : memref<9xf32, #tpu.memory_space<smem>>
    %9 = vector.broadcast %8 : f32 to vector<1x128xf32>
    %10 = arith.mulf %9, %2 : vector<1x128xf32>
    %11 = arith.addf %7, %10 : vector<1x128xf32>
    %c6 = arith.constant 6 : index
    %12 = memref.load %arg1[%c6] : memref<9xf32, #tpu.memory_space<smem>>
    %13 = vector.broadcast %12 : f32 to vector<1x128xf32>
    %14 = arith.mulf %13, %3 : vector<1x128xf32>
    %15 = arith.addf %11, %14 : vector<1x128xf32>
    %16 = vector.broadcast %4 : f32 to vector<1x128xf32>
    %17 = arith.addf %16, %15 : vector<1x128xf32>
    %18 = arith.negf %17 : vector<1x128xf32>
    %19 = math.exp %18 : vector<1x128xf32>
    %cst = arith.constant 1.000000e+00 : f32
    %20 = vector.broadcast %cst : f32 to vector<1x128xf32>
    %21 = arith.addf %20, %19 : vector<1x128xf32>
    %22 = arith.divf %20, %21 : vector<1x128xf32>
    %c1 = arith.constant 1 : index
    %23 = memref.load %arg2[%c1] : memref<3xf32, #tpu.memory_space<smem>>
    %c1_3 = arith.constant 1 : index
    %24 = memref.load %arg1[%c1_3] : memref<9xf32, #tpu.memory_space<smem>>
    %25 = vector.broadcast %24 : f32 to vector<1x128xf32>
    %26 = arith.mulf %25, %1 : vector<1x128xf32>
    %c4 = arith.constant 4 : index
    %27 = memref.load %arg1[%c4] : memref<9xf32, #tpu.memory_space<smem>>
    %28 = vector.broadcast %27 : f32 to vector<1x128xf32>
    %29 = arith.mulf %28, %2 : vector<1x128xf32>
    %30 = arith.addf %26, %29 : vector<1x128xf32>
    %c7 = arith.constant 7 : index
    %31 = memref.load %arg1[%c7] : memref<9xf32, #tpu.memory_space<smem>>
    %32 = vector.broadcast %31 : f32 to vector<1x128xf32>
    %33 = arith.mulf %32, %3 : vector<1x128xf32>
    %34 = arith.addf %30, %33 : vector<1x128xf32>
    %35 = vector.broadcast %23 : f32 to vector<1x128xf32>
    %36 = arith.addf %35, %34 : vector<1x128xf32>
    %37 = arith.negf %36 : vector<1x128xf32>
    %38 = math.exp %37 : vector<1x128xf32>
    %cst_4 = arith.constant 1.000000e+00 : f32
    %39 = vector.broadcast %cst_4 : f32 to vector<1x128xf32>
    %40 = arith.addf %39, %38 : vector<1x128xf32>
    %41 = arith.divf %39, %40 : vector<1x128xf32>
    %c2 = arith.constant 2 : index
    %42 = memref.load %arg2[%c2] : memref<3xf32, #tpu.memory_space<smem>>
    %c2_5 = arith.constant 2 : index
    %43 = memref.load %arg1[%c2_5] : memref<9xf32, #tpu.memory_space<smem>>
    %44 = vector.broadcast %43 : f32 to vector<1x128xf32>
    %45 = arith.mulf %44, %1 : vector<1x128xf32>
    %c5 = arith.constant 5 : index
    %46 = memref.load %arg1[%c5] : memref<9xf32, #tpu.memory_space<smem>>
    %47 = vector.broadcast %46 : f32 to vector<1x128xf32>
    %48 = arith.mulf %47, %2 : vector<1x128xf32>
    %49 = arith.addf %45, %48 : vector<1x128xf32>
    %c8 = arith.constant 8 : index
    %50 = memref.load %arg1[%c8] : memref<9xf32, #tpu.memory_space<smem>>
    %51 = vector.broadcast %50 : f32 to vector<1x128xf32>
    %52 = arith.mulf %51, %3 : vector<1x128xf32>
    %53 = arith.addf %49, %52 : vector<1x128xf32>
    %54 = vector.broadcast %42 : f32 to vector<1x128xf32>
    %55 = arith.addf %54, %53 : vector<1x128xf32>
    %56 = arith.negf %55 : vector<1x128xf32>
    %57 = math.exp %56 : vector<1x128xf32>
    %cst_6 = arith.constant 1.000000e+00 : f32
    %58 = vector.broadcast %cst_6 : f32 to vector<1x128xf32>
    %59 = arith.addf %58, %57 : vector<1x128xf32>
    %60 = arith.divf %58, %59 : vector<1x128xf32>
    %c0_7 = arith.constant 0 : index
    %61 = memref.load %arg4[%c0_7] : memref<2xf32, #tpu.memory_space<smem>>
    %c0_8 = arith.constant 0 : index
    %62 = memref.load %arg3[%c0_8] : memref<6xf32, #tpu.memory_space<smem>>
    %63 = vector.broadcast %62 : f32 to vector<1x128xf32>
    %64 = arith.mulf %63, %22 : vector<1x128xf32>
    %c2_9 = arith.constant 2 : index
    %65 = memref.load %arg3[%c2_9] : memref<6xf32, #tpu.memory_space<smem>>
    %66 = vector.broadcast %65 : f32 to vector<1x128xf32>
    %67 = arith.mulf %66, %41 : vector<1x128xf32>
    %68 = arith.addf %64, %67 : vector<1x128xf32>
    %c4_10 = arith.constant 4 : index
    %69 = memref.load %arg3[%c4_10] : memref<6xf32, #tpu.memory_space<smem>>
    %70 = vector.broadcast %69 : f32 to vector<1x128xf32>
    %71 = arith.mulf %70, %60 : vector<1x128xf32>
    %72 = arith.addf %68, %71 : vector<1x128xf32>
    %73 = vector.broadcast %61 : f32 to vector<1x128xf32>
    %74 = arith.addf %73, %72 : vector<1x128xf32>
    %75 = arith.negf %74 : vector<1x128xf32>
    %76 = math.exp %75 : vector<1x128xf32>
    %cst_11 = arith.constant 1.000000e+00 : f32
    %77 = vector.broadcast %cst_11 : f32 to vector<1x128xf32>
    %78 = arith.addf %77, %76 : vector<1x128xf32>
    %79 = arith.divf %77, %78 : vector<1x128xf32>
    %c1_12 = arith.constant 1 : index
    %80 = memref.load %arg4[%c1_12] : memref<2xf32, #tpu.memory_space<smem>>
    %c1_13 = arith.constant 1 : index
    %81 = memref.load %arg3[%c1_13] : memref<6xf32, #tpu.memory_space<smem>>
    %82 = vector.broadcast %81 : f32 to vector<1x128xf32>
    %83 = arith.mulf %82, %22 : vector<1x128xf32>
    %c3_14 = arith.constant 3 : index
    %84 = memref.load %arg3[%c3_14] : memref<6xf32, #tpu.memory_space<smem>>
    %85 = vector.broadcast %84 : f32 to vector<1x128xf32>
    %86 = arith.mulf %85, %41 : vector<1x128xf32>
    %87 = arith.addf %83, %86 : vector<1x128xf32>
    %c5_15 = arith.constant 5 : index
    %88 = memref.load %arg3[%c5_15] : memref<6xf32, #tpu.memory_space<smem>>
    %89 = vector.broadcast %88 : f32 to vector<1x128xf32>
    %90 = arith.mulf %89, %60 : vector<1x128xf32>
    %91 = arith.addf %87, %90 : vector<1x128xf32>
    %92 = vector.broadcast %80 : f32 to vector<1x128xf32>
    %93 = arith.addf %92, %91 : vector<1x128xf32>
    %94 = arith.negf %93 : vector<1x128xf32>
    %95 = math.exp %94 : vector<1x128xf32>
    %cst_16 = arith.constant 1.000000e+00 : f32
    %96 = vector.broadcast %cst_16 : f32 to vector<1x128xf32>
    %97 = arith.addf %96, %95 : vector<1x128xf32>
    %98 = arith.divf %96, %97 : vector<1x128xf32>
    %c0_17 = arith.constant 0 : index
    %99 = memref.load %arg5[%c0_17] : memref<2xf32, #tpu.memory_space<smem>>
    %100 = vector.broadcast %99 : f32 to vector<1x128xf32>
    %101 = arith.mulf %100, %79 : vector<1x128xf32>
    %c1_18 = arith.constant 1 : index
    %102 = memref.load %arg5[%c1_18] : memref<2xf32, #tpu.memory_space<smem>>
    %103 = vector.broadcast %102 : f32 to vector<1x128xf32>
    %104 = arith.mulf %103, %98 : vector<1x128xf32>
    %105 = arith.addf %101, %104 : vector<1x128xf32>
    %c0_19 = arith.constant 0 : index
    %106 = memref.load %arg6[%c0_19] : memref<1xf32, #tpu.memory_space<smem>>
    %107 = vector.broadcast %106 : f32 to vector<1x128xf32>
    %108 = arith.addf %105, %107 : vector<1x128xf32>
    %c0_20 = arith.constant 0 : index
    %c0_21 = arith.constant 0 : index
    %109 = vector.load %arg8[%c0_20, %c0_21] : memref<1x128xf32, #tpu.memory_space<vmem>>, vector<1x128xf32>
    tpu.vector_store %arg8[%c0_20, %c0_21], %108 {strides = array<i32>} : memref<1x128xf32, #tpu.memory_space<vmem>>, vector<1x128xf32>,
    return
  }
  func.func @transform_0(%arg0: i32) -> i32 {
    %c0_i32 = arith.constant 0 : i32
    %c0_i32_0 = arith.constant 0 : i32
    return %c0_i32 : i32
  }
  func.func @transform_1(%arg0: i32) -> i32 {
    %c0_i32 = arith.constant 0 : i32
    %c0_i32_0 = arith.constant 0 : i32
    return %c0_i32 : i32
  }
  func.func @transform_2(%arg0: i32) -> i32 {
    %c0_i32 = arith.constant 0 : i32
    %c0_i32_0 = arith.constant 0 : i32
    return %c0_i32 : i32
  }
  func.func @transform_3(%arg0: i32) -> i32 {
    %c0_i32 = arith.constant 0 : i32
    %c0_i32_0 = arith.constant 0 : i32
    return %c0_i32 : i32
  }
  func.func @transform_4(%arg0: i32) -> i32 {
    %c0_i32 = arith.constant 0 : i32
    %c0_i32_0 = arith.constant 0 : i32
    return %c0_i32 : i32
  }
  func.func @transform_5(%arg0: i32) -> i32 {
    %c0_i32 = arith.constant 0 : i32
    %c0_i32_0 = arith.constant 0 : i32
    return %c0_i32 : i32
  }
  func.func @transform_6(%arg0: i32) -> (i32, i32) {
    %c0_i32 = arith.constant 0 : i32
    %c0_i32_0 = arith.constant 0 : i32
    return %c0_i32, %arg0 : i32, i32
  }
  func.func @transform_7(%arg0: i32) -> (i32, i32) {
    %c0_i32 = arith.constant 0 : i32
    %c0_i32_0 = arith.constant 0 : i32
    return %c0_i32, %arg0 : i32, i32
  }
}

</mosaic_0001>

<bundles_post_ra>
// kernel: tpu_custom_call.1
= control target key start
LH: loop header
LB: loop body
LE: loop exit
PB: predicated region body
PF: predicated region fallthrough
CT: control target
= control target key end

     0   :  { %13 = vsyncpa [#allocation6], 0  ;;  %s444_s0 = inlined_call_operand.vmem [shape: f32[9], index: 0, kind: input, shape index: {}]   ;;  %s445_s1 = inlined_call_operand.vmem [shape: f32[3], index: 1, kind: input, shape index: {}]   ;;  %s446_s2 = inlined_call_operand.vmem [shape: f32[6], index: 2, kind: input, shape index: {}]   ;;  %s447_s3 = inlined_call_operand.hbm [shape: f32[2], index: 3, kind: input, shape index: {}]   ;;  %s448_s4 = inlined_call_operand.vmem [shape: f32[2], index: 4, kind: input, shape index: {}]   ;;  %s449_s5 = inlined_call_operand.<no memory space> [shape: f32[1], index: 5, kind: input, shape index: {}]   ;;  %s450_s6 = inlined_call_operand.vmem [shape: f32[3,128], index: 6, kind: input, shape index: {}]   ;;  %s451_s7 = inlined_call_operand.hbm [shape: f32[1,128], index: 7, kind: output, shape index: {}]  }
   0x1   :  { %14 = vsyncpa [#allocation8], 0 }
   0x2   :  { %15 = vsyncpa [#allocation5], 0 }
   0x3   :  { %16 = vsyncpa [#allocation12], 0  ;;  %s34_s26 = sshll.u32 %s445_s1, 4  ;;  %s35_s26 = int_to_ptr.vmem [resolvable:$true] %s34_s26 }
   0x4   :  { %17 = vsyncpa [#allocation4], 0  ;;  %s24_s29 = sshll.u32 %s444_s0, 4  ;;  %s282_s30 = scalar_lea.vmem %s35_s26, 16  ;;  %s25_s29 = int_to_ptr.vmem [resolvable:$true] %s24_s29 }
   0x5   :  { %p283_p0 = scmp.ne.s32.totalorder %s35_s26, %s282_s30  ;;  %p287_p1 = scmp.lt.s32.totalorder %s35_s26, %s35_s26 }
   0x6   :  { %p288_p2 = scmp.lt.s32.totalorder %s282_s30, %s282_s30 }
   0x8   :  { %p289_p3 = por %p288_p2, %p287_p1 }
   0xa   :  { %p290_p4 = pnand %p289_p3, %p283_p0 }
   0xc   :  { %293 = shalt.err (!%p290_p4)
}
   0xd   :  { %s368_s8 = smov [#allocation7]   ;;  %s294_s9 = scalar_lea.vmem %s25_s29, 16 }
   0xe   :  { %37 = dma.vmem_to_smem %s35_s26, 16, %s368_s8, [#allocation8]  }
   0xf   :  { %p295_p5 = scmp.ne.s32.totalorder %s25_s29, %s294_s9  ;;  %p299_p6 = scmp.lt.s32.totalorder %s25_s29, %s25_s29 }
  0x10   :  { %p300_p7 = scmp.lt.s32.totalorder %s294_s9, %s294_s9 }
  0x12   :  { %p301_p8 = por %p300_p7, %p299_p6 }
  0x14   :  { %p302_p9 = pnand %p301_p8, %p295_p5 }
  0x16   :  { %305 = shalt.err (!%p302_p9)
}
  0x17   :  { %s369_s1 = smov [#allocation3]   ;;  %s44_s11 = sshll.u32 %s446_s2, 4  ;;  %s45_s11 = int_to_ptr.vmem [resolvable:$true] %s44_s11 }
  0x18   :  { %27 = dma.vmem_to_smem %s25_s29, 16, %s369_s1, [#allocation6]  }
  0x19   :  { %s306_s12 = scalar_lea.vmem %s45_s11, 16  ;;  %p311_p11 = scmp.lt.s32.totalorder %s45_s11, %s45_s11 }
  0x1a   :  { %p307_p10 = scmp.ne.s32.totalorder %s45_s11, %s306_s12  ;;  %p312_p12 = scmp.lt.s32.totalorder %s306_s12, %s306_s12 }
  0x1c   :  { %p313_p13 = por %p312_p12, %p311_p11 }
  0x1e   :  { %p314_p0 = pnand %p313_p13, %p307_p10 }
  0x20   :  { %317 = shalt.err (!%p314_p0)
}
  0x21   :  { %s370_s13 = smov [#allocation9]   ;;  %s371_s14 = smov [#allocation10]  }
  0x22   :  { %47 = dma.vmem_to_smem %s45_s11, 16, %s370_s13, [#allocation8]  }
  0x23   :  { %55 = dma.hbm_to_smem %s447_s3, 16, %s371_s14, [#allocation5]  }
  0x24   :  { %s62_s19 = sshll.u32 %s448_s4, 4  ;;  %s63_s19 = int_to_ptr.vmem [resolvable:$true] %s62_s19 }
  0x25   :  { %s326_s2 = scalar_lea.vmem %s63_s19, 16  ;;  %p331_p2 = scmp.lt.s32.totalorder %s63_s19, %s63_s19 }
  0x26   :  { %p327_p1 = scmp.ne.s32.totalorder %s63_s19, %s326_s2  ;;  %p332_p3 = scmp.lt.s32.totalorder %s326_s2, %s326_s2 }
  0x28   :  { %p333_p4 = por %p332_p3, %p331_p2 }
  0x2a   :  { %p334_p5 = pnand %p333_p4, %p327_p1 }
  0x2c   :  { %337 = shalt.err (!%p334_p5)
}
  0x2d   :  { %s372_s20 = smov [#allocation11]  }
  0x2e   :  { %65 = dma.vmem_to_smem %s63_s19, 16, %s372_s20, [#allocation12]  }
  0x2f   :  { %358 = dma.done.wait [#allocation6], 16  }
  0x30   :  { %359 = vsyncadd [#allocation6], 4294967280 }
  0x31   :  { %360 = dma.done.wait [#allocation8], 32  }
  0x32   :  { %361 = vsyncadd [#allocation8], 4294967264 }
  0x33   :  { %362 = dma.done.wait [#allocation5], 16  }
  0x34   :  { %363 = vsyncadd [#allocation5], 4294967280 }
  0x35   :  { %364 = dma.done.wait [#allocation12], 16  }
  0x36   :  { %365 = vsyncadd [#allocation12], 4294967280 }
  0x37   :  { %85 = sfence }
  0x38   :  { %s88_s3 = sld [smem:[#allocation3]]  ;;  %v86_v0 = vld [vmem:[%s450_s6] sm:$0x7]  ;;  %s373_s19 = smov [#allocation13]  }
  0x39   :  { %s234_s4 = sld [smem:[#allocation3 + $0x3]]  ;;  %s222_s2 = sshll.u32 %s373_s19, 4  ;;  %s223_s2 = int_to_ptr.vmem [resolvable:$true] %s222_s2 }
  0x3a   :  { %s235_s21 = sld [smem:[#allocation3 + $0x6]]  ;;  %s338_s20 = scalar_lea.vmem %s223_s2, 16 }
  0x3b   :  { %s429_s22 = sld [smem:[#allocation7]]  ;;  %p339_p6 = scmp.ne.s32.totalorder %s223_s2, %s338_s20 }
  0x3c   :  { %s238_s23 = sld [smem:[#allocation3 + $0x1]]  ;;  %p343_p7 = scmp.lt.s32.totalorder %s223_s2, %s223_s2 }
  0x3d   :  { %s239_s26 = sld [smem:[#allocation3 + $0x4]] }
  0x3e   :  { %v89_v1 = vstv %s88_s3  ;;  %s240_s27 = sld [smem:[#allocation3 + $0x7]]  ;;  %s342_s3 = scalar_lea.vmem %s223_s2, 32 }
  0x3f   :  { %v92_v2 = vstv %s234_s4  ;;  %s434_s28 = sld [smem:[#allocation7 + $0x1]]  ;;  %v90_v3 = vmul.f32 %v89_v1, %v86_v0  ;;  %p344_p8 = scmp.lt.s32.totalorder %s342_s3, %s338_s20 }
  0x40   :  { %v93_v4 = vmul.f32 %v92_v2, %v86_v0  ;;  %v99_v5 = vstv %s235_s21  ;;  %s243_s29 = sld [smem:[#allocation3 + $0x2]] }
  0x41   :  { %v100_v6 = vmul.f32 %v99_v5, %v86_v0  ;;  %s244_s30 = sld [smem:[#allocation3 + $0x5]]  ;;  %v105_v15 = vstv %s429_s22  ;;  %p345_p9 = por %p344_p8, %p343_p7 }
  0x42   :  { %v95_v7 = vrot.slane %v93_v4, 1  ;;  %v115_v8 = vstv %s238_s23  ;;  %s245_s8 = sld [smem:[#allocation3 + $0x8]] }
  0x43   :  { %v102_v9 = vrot.slane %v100_v6, 2  ;;  %v118_v10 = vstv %s239_s26  ;;  %v116_v12 = vmul.f32 %v115_v8, %v86_v0  ;;  %s242_s6 = sld [smem:[#allocation7 + $0x2]]  ;;  %p346_p10 = pnand %p345_p9, %p339_p6 }
  0x44   :  { %v97_v11 = vadd.f32 %v95_v7, %v90_v3  ;;  %v119_v13 = vmul.f32 %v118_v10, %v86_v0  ;;  %v125_v14 = vstv %s240_s27  ;;  %s166_s9 = sld [smem:[#allocation9]] }
  0x45   :  { %v126_v16 = vmul.f32 %v125_v14, %v86_v0  ;;  %v131_v27 = vstv %s434_s28  ;;  %s251_s1 = sld [smem:[#allocation9 + $0x1]] }
  0x46   :  { %v104_v17 = vadd.f32 %v102_v9, %v97_v11  ;;  %v121_v18 = vrot.slane %v119_v13, 1  ;;  %v141_v19 = vstv %s243_s29  ;;  %s247_s0 = sld [smem:[#allocation9 + $0x2]] }
  0x47   :  { %v128_v20 = vrot.slane %v126_v16, 2  ;;  %v142_v21 = vmul.f32 %v141_v19, %v86_v0  ;;  %v144_v22 = vstv %s244_s30  ;;  %s252_s10 = sld [smem:[#allocation9 + $0x3]] }
  0x48   :  { %v106_v23 = vadd.f32 %v105_v15, %v104_v17  ;;  %v123_v24 = vadd.f32 %v121_v18, %v116_v12  ;;  %v145_v25 = vmul.f32 %v144_v22, %v86_v0  ;;  %v151_v26 = vstv %s245_s8  ;;  %s248_s11 = sld [smem:[#allocation9 + $0x4]] }
  0x49   :  { %v152_v28 = vmul.f32 %v151_v26, %v86_v0  ;;  %v157_v35 = vstv %s242_s6  ;;  %s253_s12 = sld [smem:[#allocation9 + $0x5]]  ;;  %v213_v17 = vstv %s449_s5 }
  0x4a   :  { %v236_v29 = vmul.f32 -1.442695, %v106_v23  ;;  %v130_v30 = vadd.f32 %v128_v20, %v123_v24  ;;  %v147_v31 = vrot.slane %v145_v25, 1  ;;  %v167_v47 = vstv %s166_s9  ;;  %s165_s13 = sld [smem:[#allocation10]] }
  0x4b   :  { %v154_v32 = vrot.slane %v152_v28, 2  ;;  %v187_v48 = vstv %s251_s1  ;;  %s250_s14 = sld [smem:[#allocation10 + $0x1]] }
  0x4c   :  { %262 = vpow2.f32 %v236_v29  ;;  %v132_v33 = vadd.f32 %v131_v27, %v130_v30  ;;  %v149_v34 = vadd.f32 %v147_v31, %v142_v21  ;;  %v170_v49 = vstv %s247_s0  ;;  %s205_s15 = sld [smem:[#allocation11]] }
  0x4d   :  { %v190_v50 = vstv %s252_s10  ;;  %s255_s16 = sld [smem:[#allocation11 + $0x1]] }
  0x4e   :  { %v241_v36 = vmul.f32 -1.442695, %v132_v33  ;;  %v156_v37 = vadd.f32 %v154_v32, %v149_v34  ;;  %v174_v56 = vstv %s248_s11 }
  0x4f   :  { %v194_v57 = vstv %s253_s12 }
  0x50   :  { %264 = vpow2.f32 %v241_v36  ;;  %v158_v38 = vadd.f32 %v157_v35, %v156_v37  ;;  %v177_v63 = vstv %s165_s13 }
  0x51   :  { %v197_v0 = vstv %s250_s14 }
  0x52   :  { %v246_v39 = vmul.f32 -1.442695, %v158_v38  ;;  %v206_v11 = vstv %s205_s15 }
  0x53   :  { %v209_v12 = vstv %s255_s16 }
  0x54   :  { %266 = vpow2.f32 %v246_v39 }
  0x59   :  { %v263_v40 = vpop.eup %262 }
  0x5a   :  { %v110_v41 = vadd.f32 1.0, %v263_v40 }
  0x5c   :  { %268 = vrcp.f32 %v110_v41 }
  0x5d   :  { %v265_v42 = vpop.eup %264 }
  0x5e   :  { %v136_v43 = vadd.f32 1.0, %v265_v42 }
  0x60   :  { %270 = vrcp.f32 %v136_v43 }
  0x61   :  { %v267_v44 = vpop.eup %266 }
  0x62   :  { %v162_v45 = vadd.f32 1.0, %v267_v44 }
  0x64   :  { %272 = vrcp.f32 %v162_v45 }
  0x69   :  { %v269_v46 = vpop.eup %268 }
  0x6a   :  { %v168_v51 = vmul.f32 %v269_v46, %v167_v47  ;;  %v188_v52 = vmul.f32 %v269_v46, %v187_v48 }
  0x6d   :  { %v271_v53 = vpop.eup %270 }
  0x6e   :  { %v171_v54 = vmul.f32 %v271_v53, %v170_v49  ;;  %v191_v55 = vmul.f32 %v271_v53, %v190_v50 }
  0x70   :  { %v172_v58 = vadd.f32 %v171_v54, %v168_v51  ;;  %v192_v59 = vadd.f32 %v191_v55, %v188_v52 }
  0x71   :  { %v273_v60 = vpop.eup %272 }
  0x72   :  { %v175_v61 = vmul.f32 %v273_v60, %v174_v56  ;;  %v195_v62 = vmul.f32 %v273_v60, %v194_v57 }
  0x74   :  { %v176_v1 = vadd.f32 %v175_v61, %v172_v58  ;;  %v196_v2 = vadd.f32 %v195_v62, %v192_v59 }
  0x76   :  { %v178_v3 = vadd.f32 %v177_v63, %v176_v1  ;;  %v198_v4 = vadd.f32 %v197_v0, %v196_v2 }
  0x78   :  { %v249_v5 = vmul.f32 -1.442695, %v178_v3  ;;  %v254_v6 = vmul.f32 -1.442695, %v198_v4 }
  0x7a   :  { %274 = vpow2.f32 %v249_v5 }
  0x7b   :  { %276 = vpow2.f32 %v254_v6 }
  0x87   :  { %v275_v7 = vpop.eup %274 }
  0x88   :  { %v277_v8 = vpop.eup %276  ;;  %v182_v9 = vadd.f32 1.0, %v275_v7 }
  0x89   :  { %v202_v10 = vadd.f32 1.0, %v277_v8 }
  0x8a   :  { %278 = vrcp.f32 %v182_v9 }
  0x8b   :  { %280 = vrcp.f32 %v202_v10 }
  0x97   :  { %v279_v13 = vpop.eup %278 }
  0x98   :  { %v281_v14 = vpop.eup %280  ;;  %v207_v15 = vmul.f32 %v279_v13, %v206_v11 }
  0x99   :  { %v210_v16 = vmul.f32 %v281_v14, %v209_v12 }
  0x9b   :  { %v211_v18 = vadd.f32 %v210_v16, %v207_v15 }
  0x9d   :  { %v214_v19 = vadd.f32 %v213_v17, %v211_v18 }
  0x9f   :  { %215 = vst [vmem:[#allocation13] sm:$0x1] %v214_v19 }
  0xa0   :  { %349 = shalt.err (!%p346_p10)
}
  0xa1   :  { %225 = dma.vmem_to_hbm [thread:$0]  %s223_s2, 16, %s451_s7, [#allocation4]  }
  0xa2   :  { %366 = dma.done.wait [#allocation4], 16  }
  0xa3   :  { %367 = vsyncadd [#allocation4], 4294967280 }
  0xa4   :  { %229 = vsyncpa [#allocation4], 1 }
  0xa5   :  { %230 = vsyncpa [#allocation5], 1 }
  0xa6   :  { %231 = vsyncpa [#allocation6], 1 }
  0xa7   :  { %232 = vsyncpa [#allocation8], 1 }
  0xa8   :  { %233 = vsyncpa [#allocation12], 1 }

</bundles_post_ra>
